<compile_context>
chip_gen: v6e
topology: v6e:2x2x1
jax: 0.10.0
libtpu: 0.0.40
codegen_flags: <defaults>
</compile_context>

<pallas_src>
import functools

import jax
import jax.numpy as jnp
from jax.experimental import pallas as pl
from jax.experimental.pallas import tpu as pltpu

PAD_ID = 0          # CrossEntropyLoss(ignore_index=0) in the PyTorch module
OUT_SUB, OUT_LANE = 8, 128   # lane-dense per-row-tile partial-output block


def _round_up(x, m):
    return ((x + m - 1) // m) * m


# ----------------------------------------------------------------------------
# Pallas kernel
# ----------------------------------------------------------------------------
def _ce_cloze_kernel(n_real, tn, mask_vocab,
                     x_ref, w_ref, b_ref, emb_ref, bias_ref, tgt_ref,
                     loss_ref, corr_ref,
                     hid_sc, m_sc, l_sc, t_sc):
    n = pl.program_id(0)                 # row-tile index   ("parallel")
    v = pl.program_id(1)                 # vocab-tile index ("arbitrary", innermost)
    nv = pl.num_programs(1)

    # ---- per row-tile init: context projection + target logit + acc reset --
    @pl.when(v == 0)
    def _init():
        h = jnp.dot(x_ref[...], w_ref[...],
                    preferred_element_type=jnp.float32)          # (tn, H) f32
        h = jnp.tanh(h + b_ref[...])
        h_bf = h.astype(hid_sc.dtype)
        hid_sc[...] = h_bf                                       # bf16 cache
        # Tied embeddings: input rows x == emb[target], so the target logit
        # equals hidden . x (same bf16 products as the MXU scores, VPU sum).
        t_sc[...] = jnp.sum(h_bf.astype(jnp.float32) *
                            x_ref[...].astype(jnp.float32),
                            axis=-1, keepdims=True)              # (tn, 1)
        m_sc[...] = jnp.full_like(m_sc, -jnp.inf)
        l_sc[...] = jnp.zeros_like(l_sc)

    # ---- scores for this vocab tile: contract on H (no emb transpose) ------
    scores = jax.lax.dot_general(
        hid_sc[...], emb_ref[...],
        dimension_numbers=(((1,), (1,)), ((), ())),
        preferred_element_type=jnp.float32)                      # (tn, tv) f32
    if mask_vocab:
        # precomputed additive bias: 0 for real vocab columns, -1e30 for pad
        scores = scores + bias_ref[...]

    # ---- online-softmax update (single traversal of the tile) --------------
    tile_max = jnp.max(scores, axis=-1, keepdims=True)           # (tn, 1)
    m_new = jnp.maximum(m_sc[...], tile_max)
    alpha = jnp.exp(m_sc[...] - m_new)
    p_sum = jnp.sum(jnp.exp(scores - m_new), axis=-1, keepdims=True)
    l_sc[...] = alpha * l_sc[...] + p_sum
    m_sc[...] = m_new

    # ---- finalize this row tile: CE-sum + "target attains max" count -------
    @pl.when(v == nv - 1)
    def _finalize():
        tgt = tgt_ref[...]                                       # (tn, 1) int32
        lse = m_sc[...] + jnp.log(l_sc[...])                     # (tn, 1)
        valid = (tgt != PAD_ID).astype(jnp.float32)              # loss mask only
        if n_real % tn != 0:
            row = jax.lax.broadcasted_iota(jnp.int32, tgt.shape, 0) + n * tn
            row_valid = (row < n_real).astype(jnp.float32)       # drop padded rows
        else:
            row_valid = jnp.ones_like(valid)
        loss_sum = jnp.sum((lse - t_sc[...]) * valid * row_valid)
        # accuracy counts PAD rows too (matches CE_CLOZE.get_acc); only the
        # artificially padded rows are excluded.
        correct = (t_sc[...] >= m_sc[...]).astype(jnp.float32) * row_valid
        corr_sum = jnp.sum(correct)
        # lane-dense partial-output blocks (one per row tile), summed outside.
        loss_ref[...] = jnp.broadcast_to(loss_sum, loss_ref.shape)
        corr_ref[...] = jnp.broadcast_to(corr_sum, corr_ref.shape)


# ----------------------------------------------------------------------------
# Wrapper
# ----------------------------------------------------------------------------
def ce_cloze_forward(l1_data, lengths, ind, emb, w_ctx, b_ctx, *,
                     tn=256, tv=256, emb_resident_max_bytes=16 * 1024 * 1024):
    """Mirrors CE_CLOZE.forward(batch=(lengths, l1_data, _, ind), get_acc=True)."""
    del lengths, ind   # do not affect the returned (loss, acc)
    B, T = l1_data.shape
    V, H = emb.shape
    N = B * T

    # Row tile: multiple of 8 (f32 sublane), no larger than the padded N.
    tn = _round_up(max(8, min(tn, _round_up(N, 8))), 8)

    # Vocab tile: multiple of 128 (lane).  Embedding-resident fast path when
    # the full (padded) table fits a conservative bf16 VMEM budget — the emb
    # block index becomes constant so the table is DMA'd from HBM only once.
    v_pad_full = _round_up(V, 128)
    emb_resident = (v_pad_full * H * 2) <= emb_resident_max_bytes
    if emb_resident:
        tv = v_pad_full
    else:
        tv = _round_up(max(128, min(tv, v_pad_full)), 128)

    N_pad = _round_up(N, tn)
    V_pad = _round_up(V, tv)
    NT = N_pad // tn
    VT = V_pad // tv
    mask_vocab = (V_pad != V)

    # bf16 MXU inputs, f32 accumulation inside the kernel.
    emb_bf = emb.astype(jnp.bfloat16)
    w_bf = w_ctx.astype(jnp.bfloat16)
    b_f32 = b_ctx.astype(jnp.float32)

    flat_ids = l1_data.reshape(-1).astype(jnp.int32)
    if N_pad != N:
        flat_ids = jnp.pad(flat_ids, (0, N_pad - N), constant_values=PAD_ID)
    # tied_encoder_decoder(l1_data, mode='input'): embedding gather (glue)
    x = jnp.take(emb_bf, flat_ids, axis=0)                       # (N_pad, H) bf16
    tgt = flat_ids.reshape(N_pad, 1)                             # (N_pad, 1) int32
    emb_p = emb_bf if V_pad == V else jnp.pad(emb_bf, ((0, V_pad - V), (0, 0)))
    # additive vocab-padding bias (0 real / -1e30 pad); skipped in-kernel if unused
    bias = jnp.where(jnp.arange(V_pad) < V, 0.0, -1e30
                     ).astype(jnp.float32).reshape(1, V_pad)

    kernel = functools.partial(_ce_cloze_kernel, N, tn, mask_vocab)

    # VMEM footprint: double-buffered input blocks + outputs + scratch.
    vmem_bytes = (
        2 * (tn * H * 2 + H * H * 2 + H * 4 + tv * H * 2 + tv * 4 + tn * 4)
        + 2 * 2 * OUT_SUB * OUT_LANE * 4
        + tn * H * 2 + 3 * tn * 4)
    vmem_limit = min(max(vmem_bytes + (8 << 20), 32 << 20), 64 << 20)

    emb_stream_bytes = (1 if emb_resident else NT) * V_pad * H * 2
    cost = pl.CostEstimate(
        flops=2 * N_pad * V_pad * H + 2 * N_pad * H * H,
        transcendentals=N_pad * V_pad + N_pad * H,
        bytes_accessed=emb_stream_bytes + N_pad * H * 2 + H * H * 2
        + N_pad * 4 + NT * 2 * OUT_SUB * OUT_LANE * 4,
    )

    loss_part, corr_part = pl.pallas_call(
        kernel,
        out_shape=(
            jax.ShapeDtypeStruct((NT, OUT_SUB, OUT_LANE), jnp.float32),
            jax.ShapeDtypeStruct((NT, OUT_SUB, OUT_LANE), jnp.float32),
        ),
        grid_spec=pltpu.PrefetchScalarGridSpec(
            num_scalar_prefetch=0,
            grid=(NT, VT),                                        # vocab innermost
            in_specs=[
                pl.BlockSpec((tn, H), lambda n, v: (n, 0)),       # embedded tokens
                pl.BlockSpec((H, H), lambda n, v: (0, 0)),        # context weight
                pl.BlockSpec((1, H), lambda n, v: (0, 0)),        # context bias
                pl.BlockSpec((tv, H), lambda n, v: (v, 0)),       # tied embedding
                pl.BlockSpec((1, tv), lambda n, v: (0, v)),       # vocab-pad bias
                pl.BlockSpec((tn, 1), lambda n, v: (n, 0)),       # targets
            ],
            out_specs=[
                pl.BlockSpec((1, OUT_SUB, OUT_LANE), lambda n, v: (n, 0, 0)),
                pl.BlockSpec((1, OUT_SUB, OUT_LANE), lambda n, v: (n, 0, 0)),
            ],
            scratch_shapes=[
                pltpu.VMEM((tn, H), jnp.bfloat16),                # cached hidden
                pltpu.VMEM((tn, 1), jnp.float32),                 # running max
                pltpu.VMEM((tn, 1), jnp.float32),                 # running sum-exp
                pltpu.VMEM((tn, 1), jnp.float32),                 # target logit
            ],
        ),
        compiler_params=pltpu.CompilerParams(
            # N tiles split across TensorCores on v7x; vocab is a reduction.
            dimension_semantics=("parallel", "arbitrary"),
            vmem_limit_bytes=vmem_limit,
        ),
        cost_estimate=cost,
    )(x, w_bf, b_f32, emb_p, bias, tgt)

    loss = jnp.sum(loss_part[:, 0, 0])
    correct = jnp.sum(corr_part[:, 0, 0])
    acc = correct / jnp.float32(N)
    return loss, acc


# ----------------------------------------------------------------------------
# Pure-JAX reference (f32) for a sanity check
# ----------------------------------------------------------------------------
def ce_cloze_reference(l1_data, emb, w_ctx, b_ctx):
    ids = l1_data.reshape(-1).astype(jnp.int32)
    x = jnp.take(emb, ids, axis=0)
    hidden = jnp.tanh(x @ w_ctx + b_ctx)
    scores = hidden @ emb.T
    lse = jax.scipy.special.logsumexp(scores, axis=-1)
    tgt_logit = jnp.take_along_axis(scores, ids[:, None], axis=-1)[:, 0]
    valid = (ids != PAD_ID).astype(jnp.float32)
    loss = jnp.sum((lse - tgt_logit) * valid)
    argmax = jnp.argmax(scores, axis=-1).astype(jnp.int32)
    acc = jnp.mean((argmax == ids).astype(jnp.float32))
    return loss, acc


# ----------------------------------------------------------------------------
# Main: deterministic params + small synthetic batch
# ----------------------------------------------------------------------------
if __name__ == "__main__":
    B, T, V, H = 2, 8, 500, 128   # batch, seq, vocab (non-multiple of 128), hidden

    key = jax.random.PRNGKey(0)
    k_emb, k_w, k_b, k_tok, k_ind = jax.random.split(key, 5)

    # tied_encoder_decoder parameters: embedding table (V, H), tied for output
    emb = jax.random.normal(k_emb, (V, H), dtype=jnp.float32) * 0.1
    # context_encoder stand-in parameters
    w_ctx = jax.random.normal(k_w, (H, H), dtype=jnp.float32) * 0.1
    b_ctx = jax.random.normal(k_b, (1, H), dtype=jnp.float32) * 0.01

    # synthetic batch = (lengths, l1_data, _, ind)
    lengths = jnp.array([8, 6], dtype=jnp.int32)
    tok = jax.random.randint(k_tok, (B, T), 1, V, dtype=jnp.int32)
    pos = jnp.arange(T, dtype=jnp.int32)[None, :]
    pad_mask = pos < lengths[:, None]
    l1_data = jnp.where(pad_mask, tok, PAD_ID)                    # 0 = PAD
    ind = jnp.where(pad_mask,
                    jax.random.randint(k_ind, (B, T), 1, 3, dtype=jnp.int32),
                    0)

    loss_ref, acc_ref = ce_cloze_reference(l1_data, emb, w_ctx, b_ctx)
    jax.block_until_ready((loss_ref, acc_ref))

    # Run 1: default tiles -> embedding-resident fast path (VT == 1).
    loss1, acc1 = ce_cloze_forward(l1_data, lengths, ind, emb, w_ctx, b_ctx)
    jax.block_until_ready((loss1, acc1))

    # Run 2: force the streaming path (VT > 1, NT > 1) to exercise the
    # online-softmax accumulation and the vocab-padding bias.
    loss2, acc2 = ce_cloze_forward(l1_data, lengths, ind, emb, w_ctx, b_ctx,
                                   tn=8, tv=256, emb_resident_max_bytes=0)
    jax.block_until_ready((loss2, acc2))

    for loss, acc in ((loss1, acc1), (loss2, acc2)):
        assert jnp.isfinite(loss)
        assert 0.0 <= float(acc) <= 1.0
        # bf16 MXU inputs vs f32 reference -> loose tolerance on the summed loss
        assert jnp.allclose(loss, loss_ref, rtol=5e-2, atol=5e-1), (loss, loss_ref)
    # the two kernel configurations must agree with each other tightly
    assert jnp.allclose(loss1, loss2, rtol=1e-3, atol=1e-2), (loss1, loss2)

    print("KERNEL_OK")
</pallas_src>

<mosaic_0001>
module attributes {stable_mosaic.version = 11 : i64} {
  func.func @_ce_cloze_kernel(%arg0: i32, %arg1: i32, %arg2: memref<16x128xbf16, #tpu.memory_space<vmem>>, %arg3: memref<128x128xbf16, #tpu.memory_space<vmem>>, %arg4: memref<1x128xf32, #tpu.memory_space<vmem>>, %arg5: memref<512x128xbf16, #tpu.memory_space<vmem>>, %arg6: memref<1x512xf32, #tpu.memory_space<vmem>>, %arg7: memref<16x1xi32, #tpu.memory_space<vmem>>, %arg8: memref<1x8x128xf32, #tpu.memory_space<vmem>>, %arg9: memref<1x8x128xf32, #tpu.memory_space<vmem>>, %arg10: memref<16x128xbf16, #tpu.memory_space<vmem>>, %arg11: memref<16x1xf32, #tpu.memory_space<vmem>>, %arg12: memref<16x1xf32, #tpu.memory_space<vmem>>, %arg13: memref<16x1xf32, #tpu.memory_space<vmem>>) attributes {dimension_semantics = [#tpu.dimension_semantics<parallel>, #tpu.dimension_semantics<arbitrary>], iteration_bounds = array<i64: 1, 1>, scalar_prefetch = 0 : i64, scratch_operands = 4 : i64, tpu.core_type = #tpu.core_type<tc>, window_params = [{transform_indices = @transform_0, window_bounds = array<i64: 16, 128>}, {pipeline_mode = #tpu.pipeline_mode<synchronous>, transform_indices = @transform_1, window_bounds = array<i64: 128, 128>}, {pipeline_mode = #tpu.pipeline_mode<synchronous>, transform_indices = @transform_2, window_bounds = array<i64: 1, 128>}, {transform_indices = @transform_3, window_bounds = array<i64: 512, 128>}, {transform_indices = @transform_4, window_bounds = array<i64: 1, 512>}, {transform_indices = @transform_5, window_bounds = array<i64: 16, 1>}, {transform_indices = @transform_6, window_bounds = array<i64: 1, 8, 128>}, {transform_indices = @transform_7, window_bounds = array<i64: 1, 8, 128>}]} {
    %c0_i32 = arith.constant 0 : i32
    %0 = arith.cmpi eq, %arg1, %c0_i32 : i32
    %1 = arith.extui %0 : i1 to i32
    %c0_i32_0 = arith.constant 0 : i32
    %2 = arith.cmpi ne, %1, %c0_i32_0 : i32
    scf.if %2 {
      %c0_20 = arith.constant 0 : index
      %c0_21 = arith.constant 0 : index
      %29 = vector.load %arg2[%c0_20, %c0_21] : memref<16x128xbf16, #tpu.memory_space<vmem>>, vector<16x128xbf16>
      %c0_22 = arith.constant 0 : index
      %c0_23 = arith.constant 0 : index
      %30 = vector.load %arg3[%c0_22, %c0_23] : memref<128x128xbf16, #tpu.memory_space<vmem>>, vector<128x128xbf16>
      %cst_24 = arith.constant dense<0.000000e+00> : vector<16x128xf32>
      %31 = tpu.matmul %29, %30, %cst_24 {dimension_numbers = #tpu.dot_dimension_numbers<[1], [0], [0], [1], [0, 0, 1, 1], [], []>} : vector<16x128xbf16>, vector<128x128xbf16>, vector<16x128xf32> -> vector<16x128xf32>
      %c0_25 = arith.constant 0 : index
      %c0_26 = arith.constant 0 : index
      %32 = vector.load %arg4[%c0_25, %c0_26] : memref<1x128xf32, #tpu.memory_space<vmem>>, vector<1x128xf32>
      %33 = vector.broadcast %32 : vector<1x128xf32> to vector<16x128xf32>
      %34 = arith.addf %31, %33 : vector<16x128xf32>
      %35 = math.tanh %34 : vector<16x128xf32>
      %36 = arith.truncf %35 : vector<16x128xf32> to vector<16x128xbf16>
      %c0_27 = arith.constant 0 : index
      %c0_28 = arith.constant 0 : index
      %37 = vector.load %arg10[%c0_27, %c0_28] : memref<16x128xbf16, #tpu.memory_space<vmem>>, vector<16x128xbf16>
      tpu.vector_store %arg10[%c0_27, %c0_28], %36 {strides = array<i32>} : memref<16x128xbf16, #tpu.memory_space<vmem>>, vector<16x128xbf16>,
      %38 = arith.extf %36 : vector<16x128xbf16> to vector<16x128xf32>
      %c0_29 = arith.constant 0 : index
      %c0_30 = arith.constant 0 : index
      %39 = vector.load %arg2[%c0_29, %c0_30] : memref<16x128xbf16, #tpu.memory_space<vmem>>, vector<16x128xbf16>
      %40 = arith.extf %39 : vector<16x128xbf16> to vector<16x128xf32>
      %41 = arith.mulf %38, %40 : vector<16x128xf32>
      %cst_31 = arith.constant dense<0.000000e+00> : vector<16xf32>
      %42 = vector.multi_reduction <add>, %41, %cst_31 [1] : vector<16x128xf32> to vector<16xf32>
      %43 = vector.shape_cast %42 : vector<16xf32> to vector<16x1xf32>
      %c0_32 = arith.constant 0 : index
      %c0_33 = arith.constant 0 : index
      %44 = vector.load %arg13[%c0_32, %c0_33] : memref<16x1xf32, #tpu.memory_space<vmem>>, vector<16x1xf32>
      tpu.vector_store %arg13[%c0_32, %c0_33], %43 {strides = array<i32>} : memref<16x1xf32, #tpu.memory_space<vmem>>, vector<16x1xf32>,
      %cst_34 = arith.constant 0xFF800000 : f32
      %45 = vector.broadcast %cst_34 : f32 to vector<16x1xf32>
      %c0_35 = arith.constant 0 : index
      %c0_36 = arith.constant 0 : index
      %46 = vector.load %arg11[%c0_35, %c0_36] : memref<16x1xf32, #tpu.memory_space<vmem>>, vector<16x1xf32>
      tpu.vector_store %arg11[%c0_35, %c0_36], %45 {strides = array<i32>} : memref<16x1xf32, #tpu.memory_space<vmem>>, vector<16x1xf32>,
      %cst_37 = arith.constant 0.000000e+00 : f32
      %47 = vector.broadcast %cst_37 : f32 to vector<16x1xf32>
      %c0_38 = arith.constant 0 : index
      %c0_39 = arith.constant 0 : index
      %48 = vector.load %arg12[%c0_38, %c0_39] : memref<16x1xf32, #tpu.memory_space<vmem>>, vector<16x1xf32>
      tpu.vector_store %arg12[%c0_38, %c0_39], %47 {strides = array<i32>} : memref<16x1xf32, #tpu.memory_space<vmem>>, vector<16x1xf32>,
    } else {
    }
    %c0 = arith.constant 0 : index
    %c0_1 = arith.constant 0 : index
    %3 = vector.load %arg10[%c0, %c0_1] : memref<16x128xbf16, #tpu.memory_space<vmem>>, vector<16x128xbf16>
    %c0_2 = arith.constant 0 : index
    %c0_3 = arith.constant 0 : index
    %4 = vector.load %arg5[%c0_2, %c0_3] : memref<512x128xbf16, #tpu.memory_space<vmem>>, vector<512x128xbf16>
    %cst = arith.constant dense<0.000000e+00> : vector<16x512xf32>
    %5 = tpu.matmul %3, %4, %cst {dimension_numbers = #tpu.dot_dimension_numbers<[1], [1], [0], [0], [0, 0, 1, 0], [], []>} : vector<16x128xbf16>, vector<512x128xbf16>, vector<16x512xf32> -> vector<16x512xf32>
    %c0_4 = arith.constant 0 : index
    %c0_5 = arith.constant 0 : index
    %6 = vector.load %arg6[%c0_4, %c0_5] : memref<1x512xf32, #tpu.memory_space<vmem>>, vector<1x512xf32>
    %7 = vector.broadcast %6 : vector<1x512xf32> to vector<16x512xf32>
    %8 = arith.addf %5, %7 : vector<16x512xf32>
    %cst_6 = arith.constant dense<0xFF800000> : vector<16xf32>
    %9 = vector.multi_reduction <maximumf>, %8, %cst_6 [1] : vector<16x512xf32> to vector<16xf32>
    %10 = vector.shape_cast %9 : vector<16xf32> to vector<16x1xf32>
    %c0_7 = arith.constant 0 : index
    %c0_8 = arith.constant 0 : index
    %11 = vector.load %arg11[%c0_7, %c0_8] : memref<16x1xf32, #tpu.memory_space<vmem>>, vector<16x1xf32>
    %12 = arith.maximumf %11, %10 : vector<16x1xf32>
    %c0_9 = arith.constant 0 : index
    %c0_10 = arith.constant 0 : index
    %13 = vector.load %arg11[%c0_9, %c0_10] : memref<16x1xf32, #tpu.memory_space<vmem>>, vector<16x1xf32>
    %14 = arith.subf %13, %12 : vector<16x1xf32>
    %15 = math.exp %14 : vector<16x1xf32>
    %16 = vector.broadcast %12 : vector<16x1xf32> to vector<16x512xf32>
    %17 = arith.subf %8, %16 : vector<16x512xf32>
    %18 = math.exp %17 : vector<16x512xf32>
    %cst_11 = arith.constant dense<0.000000e+00> : vector<16xf32>
    %19 = vector.multi_reduction <add>, %18, %cst_11 [1] : vector<16x512xf32> to vector<16xf32>
    %20 = vector.shape_cast %19 : vector<16xf32> to vector<16x1xf32>
    %c0_12 = arith.constant 0 : index
    %c0_13 = arith.constant 0 : index
    %21 = vector.load %arg12[%c0_12, %c0_13] : memref<16x1xf32, #tpu.memory_space<vmem>>, vector<16x1xf32>
    %22 = arith.mulf %15, %21 : vector<16x1xf32>
    %23 = arith.addf %22, %20 : vector<16x1xf32>
    %c0_14 = arith.constant 0 : index
    %c0_15 = arith.constant 0 : index
    %24 = vector.load %arg12[%c0_14, %c0_15] : memref<16x1xf32, #tpu.memory_space<vmem>>, vector<16x1xf32>
    tpu.vector_store %arg12[%c0_14, %c0_15], %23 {strides = array<i32>} : memref<16x1xf32, #tpu.memory_space<vmem>>, vector<16x1xf32>,
    %c0_16 = arith.constant 0 : index
    %c0_17 = arith.constant 0 : index
    %25 = vector.load %arg11[%c0_16, %c0_17] : memref<16x1xf32, #tpu.memory_space<vmem>>, vector<16x1xf32>
    tpu.vector_store %arg11[%c0_16, %c0_17], %12 {strides = array<i32>} : memref<16x1xf32, #tpu.memory_space<vmem>>, vector<16x1xf32>,
    %c0_i32_18 = arith.constant 0 : i32
    %26 = arith.cmpi eq, %arg1, %c0_i32_18 : i32
    %27 = arith.extui %26 : i1 to i32
    %c0_i32_19 = arith.constant 0 : i32
    %28 = arith.cmpi ne, %27, %c0_i32_19 : i32
    scf.if %28 {
      %c0_20 = arith.constant 0 : index
      %c0_21 = arith.constant 0 : index
      %29 = vector.load %arg7[%c0_20, %c0_21] : memref<16x1xi32, #tpu.memory_space<vmem>>, vector<16x1xi32>
      %c0_22 = arith.constant 0 : index
      %c0_23 = arith.constant 0 : index
      %30 = vector.load %arg11[%c0_22, %c0_23] : memref<16x1xf32, #tpu.memory_space<vmem>>, vector<16x1xf32>
      %c0_24 = arith.constant 0 : index
      %c0_25 = arith.constant 0 : index
      %31 = vector.load %arg12[%c0_24, %c0_25] : memref<16x1xf32, #tpu.memory_space<vmem>>, vector<16x1xf32>
      %32 = math.log %31 : vector<16x1xf32>
      %33 = arith.addf %30, %32 : vector<16x1xf32>
      %c0_i32_26 = arith.constant 0 : i32
      %34 = vector.broadcast %c0_i32_26 : i32 to vector<16x1xi32>
      %35 = arith.cmpi ne, %29, %34 : vector<16x1xi32>
      %36 = arith.extui %35 : vector<16x1xi1> to vector<16x1xi32>
      %37 = arith.sitofp %36 : vector<16x1xi32> to vector<16x1xf32>
      %cst_27 = arith.constant 1.000000e+00 : f32
      %38 = vector.broadcast %cst_27 : f32 to vector<16x1xf32>
      %c0_28 = arith.constant 0 : index
      %c0_29 = arith.constant 0 : index
      %39 = vector.load %arg13[%c0_28, %c0_29] : memref<16x1xf32, #tpu.memory_space<vmem>>, vector<16x1xf32>
      %40 = arith.subf %33, %39 : vector<16x1xf32>
      %41 = arith.mulf %40, %37 : vector<16x1xf32>
      %42 = arith.mulf %41, %38 : vector<16x1xf32>
      %43 = vector.shape_cast %42 : vector<16x1xf32> to vector<1x16x1xf32>
      %cst_30 = arith.constant dense<0.000000e+00> : vector<1xf32>
      %44 = vector.multi_reduction <add>, %43, %cst_30 [1, 2] : vector<1x16x1xf32> to vector<1xf32>
      %45 = vector.shape_cast %44 : vector<1xf32> to vector<1x1x1xf32>
      %46 = vector.extract %45[0, 0, 0] : f32 from vector<1x1x1xf32>
      %c0_31 = arith.constant 0 : index
      %c0_32 = arith.constant 0 : index
      %47 = vector.load %arg13[%c0_31, %c0_32] : memref<16x1xf32, #tpu.memory_space<vmem>>, vector<16x1xf32>
      %c0_33 = arith.constant 0 : index
      %c0_34 = arith.constant 0 : index
      %48 = vector.load %arg11[%c0_33, %c0_34] : memref<16x1xf32, #tpu.memory_space<vmem>>, vector<16x1xf32>
      %49 = arith.cmpf oge, %47, %48 : vector<16x1xf32>
      %50 = arith.extui %49 : vector<16x1xi1> to vector<16x1xi32>
      %51 = arith.sitofp %50 : vector<16x1xi32> to vector<16x1xf32>
      %52 = arith.mulf %51, %38 : vector<16x1xf32>
      %53 = vector.shape_cast %52 : vector<16x1xf32> to vector<1x16x1xf32>
      %cst_35 = arith.constant dense<0.000000e+00> : vector<1xf32>
      %54 = vector.multi_reduction <add>, %53, %cst_35 [1, 2] : vector<1x16x1xf32> to vector<1xf32>
      %55 = vector.shape_cast %54 : vector<1xf32> to vector<1x1x1xf32>
      %56 = vector.extract %55[0, 0, 0] : f32 from vector<1x1x1xf32>
      %57 = vector.broadcast %46 : f32 to vector<1x8x128xf32>
      %c0_36 = arith.constant 0 : index
      %c0_37 = arith.constant 0 : index
      %c0_38 = arith.constant 0 : index
      %58 = vector.load %arg8[%c0_36, %c0_37, %c0_38] : memref<1x8x128xf32, #tpu.memory_space<vmem>>, vector<1x8x128xf32>
      tpu.vector_store %arg8[%c0_36, %c0_37, %c0_38], %57 {strides = array<i32>} : memref<1x8x128xf32, #tpu.memory_space<vmem>>, vector<1x8x128xf32>,
      %59 = vector.broadcast %56 : f32 to vector<1x8x128xf32>
      %c0_39 = arith.constant 0 : index
      %c0_40 = arith.constant 0 : index
      %c0_41 = arith.constant 0 : index
      %60 = vector.load %arg9[%c0_39, %c0_40, %c0_41] : memref<1x8x128xf32, #tpu.memory_space<vmem>>, vector<1x8x128xf32>
      tpu.vector_store %arg9[%c0_39, %c0_40, %c0_41], %59 {strides = array<i32>} : memref<1x8x128xf32, #tpu.memory_space<vmem>>, vector<1x8x128xf32>,
    } else {
    }
    return
  }
  func.func @transform_0(%arg0: i32, %arg1: i32) -> (i32, i32) {
    %c0_i32 = arith.constant 0 : i32
    %c0_i32_0 = arith.constant 0 : i32
    return %arg0, %c0_i32 : i32, i32
  }
  func.func @transform_1(%arg0: i32, %arg1: i32) -> (i32, i32) {
    %c0_i32 = arith.constant 0 : i32
    %c0_i32_0 = arith.constant 0 : i32
    %c0_i32_1 = arith.constant 0 : i32
    return %c0_i32, %c0_i32_0 : i32, i32
  }
  func.func @transform_2(%arg0: i32, %arg1: i32) -> (i32, i32) {
    %c0_i32 = arith.constant 0 : i32
    %c0_i32_0 = arith.constant 0 : i32
    %c0_i32_1 = arith.constant 0 : i32
    return %c0_i32, %c0_i32_0 : i32, i32
  }
  func.func @transform_3(%arg0: i32, %arg1: i32) -> (i32, i32) {
    %c0_i32 = arith.constant 0 : i32
    %c0_i32_0 = arith.constant 0 : i32
    return %arg1, %c0_i32 : i32, i32
  }
  func.func @transform_4(%arg0: i32, %arg1: i32) -> (i32, i32) {
    %c0_i32 = arith.constant 0 : i32
    %c0_i32_0 = arith.constant 0 : i32
    return %c0_i32, %arg1 : i32, i32
  }
  func.func @transform_5(%arg0: i32, %arg1: i32) -> (i32, i32) {
    %c0_i32 = arith.constant 0 : i32
    %c0_i32_0 = arith.constant 0 : i32
    return %arg0, %c0_i32 : i32, i32
  }
  func.func @transform_6(%arg0: i32, %arg1: i32) -> (i32, i32, i32) {
    %c0_i32 = arith.constant 0 : i32
    %c0_i32_0 = arith.constant 0 : i32
    %c0_i32_1 = arith.constant 0 : i32
    return %arg0, %c0_i32, %c0_i32_0 : i32, i32, i32
  }
  func.func @transform_7(%arg0: i32, %arg1: i32) -> (i32, i32, i32) {
    %c0_i32 = arith.constant 0 : i32
    %c0_i32_0 = arith.constant 0 : i32
    %c0_i32_1 = arith.constant 0 : i32
    return %arg0, %c0_i32, %c0_i32_0 : i32, i32, i32
  }
}

</mosaic_0001>

<bundles_post_ra>
// kernel: tpu_custom_call.1
= control target key start
LH: loop header
LB: loop body
LE: loop exit
PB: predicated region body
PF: predicated region fallthrough
CT: control target
= control target key end

     0   :  { %13 = vsyncpa [#allocation7], 0  ;;  %s1166_s0 = inlined_call_operand.vmem [shape: bf16[16,128], index: 0, kind: input, shape index: {}]   ;;  %s1167_s1 = inlined_call_operand.hbm [shape: bf16[128,128], index: 1, kind: input, shape index: {}]   ;;  %s1168_s2 = inlined_call_operand.vmem [shape: f32[1,128], index: 2, kind: input, shape index: {}]   ;;  %s1169_s3 = inlined_call_operand.hbm [shape: bf16[512,128], index: 3, kind: input, shape index: {}]   ;;  %s1170_s4 = inlined_call_operand.vmem [shape: f32[1,512], index: 4, kind: input, shape index: {}]   ;;  %s1171_s5 = inlined_call_operand.vmem [shape: s32[16,1], index: 5, kind: input, shape index: {}]   ;;  %s1172_s6 = inlined_call_operand.hbm [shape: f32[1,8,128], index: 6, kind: output, shape index: {0}]   ;;  %s1173_s7 = inlined_call_operand.hbm [shape: f32[1,8,128], index: 7, kind: output, shape index: {1}]  }
   0x1   :  { %14 = vsyncpa [#allocation10], 0 }
   0x2   :  { %15 = vsyncpa [#allocation8], 0 }
   0x3   :  { %16 = vsyncpa [#allocation13], 0  ;;  %s1048_s24 = smov [#allocation6]  }
   0x4   :  { %s24_s25 = sshll.u32 %s1048_s24, 4  ;;  %s25_s25 = int_to_ptr.vmem [resolvable:$true] %s24_s25 }
   0x5   :  { %s968_s26 = scalar_lea.vmem %s25_s25, 1024  ;;  %p973_p1 = scmp.lt.s32.totalorder %s25_s25, %s25_s25 }
   0x6   :  { %p969_p0 = scmp.ne.s32.totalorder %s25_s25, %s968_s26  ;;  %p974_p2 = scmp.lt.s32.totalorder %s968_s26, %s968_s26 }
   0x8   :  { %p975_p3 = por %p974_p2, %p973_p1 }
   0xa   :  { %p976_p4 = pnand %p975_p3, %p969_p0 }
   0xc   :  { %979 = shalt.err (!%p976_p4)
}
   0xd   :  { %s1049_s27 = smov 64   ;;  %s1050_s28 = smov 4  }
   0xe   :  { %30 = dma.hbm_to_vmem [thread:$0]  %s1167_s1, 1024, %s25_s25, [#allocation7], %s1049_s27, %s1049_s27, %s1050_s28  }
   0xf   :  { %s1051_s8 = smov [#allocation9]  }
  0x10   :  { %s38_s9 = sshll.u32 %s1051_s8, 4  ;;  %s39_s9 = int_to_ptr.vmem [resolvable:$true] %s38_s9 }
  0x11   :  { %s988_s10 = scalar_lea.vmem %s39_s9, 4096  ;;  %p993_p6 = scmp.lt.s32.totalorder %s39_s9, %s39_s9 }
  0x12   :  { %p989_p5 = scmp.ne.s32.totalorder %s39_s9, %s988_s10  ;;  %p994_p7 = scmp.lt.s32.totalorder %s988_s10, %s988_s10 }
  0x14   :  { %p995_p8 = por %p994_p7, %p993_p6 }
  0x16   :  { %p996_p9 = pnand %p995_p8, %p989_p5 }
  0x18   :  { %999 = shalt.err (!%p996_p9)
}
  0x19   :  { %44 = dma.hbm_to_vmem [thread:$0]  %s1169_s3, 4096, %s39_s9, [#allocation10], %s1049_s27, %s1049_s27, %s1050_s28  }
  0x1a   :  { %1040 = dma.done.wait [#allocation7], 1024  }
  0x1b   :  { %1041 = vsyncadd [#allocation7], 4294966272 }
  0x1c   :  { %1042 = dma.done.wait [#allocation10], 4096  }
  0x1d   :  { %1043 = vsyncadd [#allocation10], 4294963200  ;;  %v1052_v0 = vmov 0.0   ;;  %vm1053_vm0 = vmmov 0   ;;  %v890_v1 = vld [vmem:[#allocation6 + $0x38] sm:$0xff]   ;;  %v891_v2 = vld [vmem:[#allocation6 + $0x30] sm:$0xff]   ;;  %v279_v54 = vlaneseq }
  0x1e   :  { %854 = vmatprep.subr.bf16.mxu0 %v1052_v0  ;;  %870 = vmatprep.mubr.msk.bf16.mxu0 %vm1053_vm0, %v1052_v0  ;;  %v892_v3 = vld [vmem:[#allocation6 + $0x28] sm:$0xff]   ;;  %v899_v4 = vld [vmem:[#allocation9 + $0x78] sm:$0xff]   ;;  %v893_v5 = vld [vmem:[#allocation6 + $0x20] sm:$0xff]   ;;  %vm204_vm1 = vcmask 7168   ;;  %v1054_v53 = vmov -inf   ;;  %s1057_s22 = smov [#allocation12]  }
  0x1f   :  { %855 = vmatpush3.bf16.msra.mxu0 %v890_v1  ;;  %818 = vmatprep.subr.bf16.mxu1 %v899_v4  ;;  %v901_v6 = vld [vmem:[#allocation9 + $0x38] sm:$0xff]   ;;  %v903_v7 = vld [vmem:[#allocation9 + $0x70] sm:$0xff]   ;;  %v907_v11 = vld [vmem:[#allocation9 + $0x68] sm:$0xff]   ;;  %207 = vst.msk [vmem:[#allocation3] sm:$0xff] %vm204_vm1, %v1054_v53  ;;  %v280_v55 = vshrl.u32 %v279_v54, 7  ;;  %s735_s23 = sshll.u32 %s1057_s22, 4  ;;  %s736_s23 = int_to_ptr.vmem [resolvable:$true] %s735_s23 }
  0x20   :  { %856 = vmatprep.subr.bf16.mxu0 %v1052_v0  ;;  %819 = vmatpush3.bf16.xpose.msra.mxu1 %v901_v6  ;;  %v894_v8 = vld [vmem:[#allocation6 + $0x18] sm:$0xff]   ;;  %v895_v9 = vld [vmem:[#allocation6 + $0x10] sm:$0xff]   ;;  %v896_v12 = vld [vmem:[#allocation6 + $0x8] sm:$0xff]   ;;  %208 = vst.msk [vmem:[#allocation3 + $0x8] sm:$0xff] %vm204_vm1, %v1054_v53 }
  0x21   :  { %820 = vmatprep.subr.bf16.mxu1 %v903_v7  ;;  %v905_v10 = vld [vmem:[#allocation9 + $0x30] sm:$0xff]   ;;  %v897_v13 = vld [vmem:[#allocation6] sm:$0xff]   ;;  %v909_v14 = vld [vmem:[#allocation9 + $0x28] sm:$0xff]   ;;  %209 = vst.msk [vmem:[#allocation4] sm:$0xff] %vm204_vm1, %v1052_v0  ;;  %v281_v56 = vsub.s32 0, %v280_v55  ;;  %v289_v57 = vsub.s32 2, %v280_v55 }
  0x22   :  { %v900_v15 = vld [vmem:[#allocation9 + $0xf8] sm:$0xff]   ;;  %v911_v16 = vld [vmem:[#allocation9 + $0x60] sm:$0xff]   ;;  %v898_v17 = vld [vmem:[%s1166_s0] sm:$0xff]   ;;  %210 = vst.msk [vmem:[#allocation4 + $0x8] sm:$0xff] %vm204_vm1, %v1052_v0  ;;  %v285_v59 = vsub.s32 1, %v280_v55  ;;  %v293_v60 = vsub.s32 3, %v280_v55 }
  0x23   :  { %857 = vmatpush3.bf16.msra.mxu0 %v891_v2  ;;  %v902_v18 = vld [vmem:[#allocation9 + $0xb8] sm:$0xff]   ;;  %v904_v19 = vld [vmem:[#allocation9 + $0xf0] sm:$0xff]   ;;  %v913_v20 = vld [vmem:[#allocation9 + $0x20] sm:$0xff]  }
  0x24   :  { %858 = vmatprep.subr.bf16.mxu0 %v1052_v0  ;;  %v906_v21 = vld [vmem:[#allocation9 + $0xb0] sm:$0xff]   ;;  %v908_v22 = vld [vmem:[#allocation9 + $0xe8] sm:$0xff]   ;;  %v912_v24 = vld [vmem:[#allocation9 + $0xe0] sm:$0xff]  }
  0x25   :  { %v910_v23 = vld [vmem:[#allocation9 + $0xa8] sm:$0xff]   ;;  %v914_v25 = vld [vmem:[#allocation9 + $0xa0] sm:$0xff]   ;;  %v915_v26 = vld [vmem:[#allocation9 + $0x58] sm:$0xff]  }
  0x26   :  { %v916_v27 = vld [vmem:[#allocation9 + $0xd8] sm:$0xff]   ;;  %v919_v30 = vld [vmem:[#allocation9 + $0x50] sm:$0xff]   ;;  %v923_v34 = vld [vmem:[#allocation9 + $0x48] sm:$0xff]  }
  0x27   :  { %859 = vmatpush3.bf16.msra.mxu0 %v892_v3  ;;  %v917_v28 = vld [vmem:[#allocation9 + $0x18] sm:$0xff]   ;;  %v920_v31 = vld [vmem:[#allocation9 + $0xd0] sm:$0xff]   ;;  %v924_v35 = vld [vmem:[#allocation9 + $0xc8] sm:$0xff]  }
  0x28   :  { %860 = vmatprep.subr.bf16.mxu0 %v1052_v0  ;;  %821 = vmatpush3.bf16.xpose.msra.mxu1 %v905_v10  ;;  %v918_v29 = vld [vmem:[#allocation9 + $0x98] sm:$0xff]   ;;  %v921_v32 = vld [vmem:[#allocation9 + $0x10] sm:$0xff]   ;;  %v925_v36 = vld [vmem:[#allocation9 + $0x8] sm:$0xff]  }
  0x29   :  { %822 = vmatprep.subr.bf16.mxu1 %v907_v11  ;;  %v922_v33 = vld [vmem:[#allocation9 + $0x90] sm:$0xff]   ;;  %v926_v37 = vld [vmem:[#allocation9 + $0x88] sm:$0xff]   ;;  %v927_v38 = vld [vmem:[#allocation9 + $0x40] sm:$0xff]  }
  0x2a   :  { %v928_v39 = vld [vmem:[#allocation9 + $0xc0] sm:$0xff]   ;;  %v749_v42 = vld [vmem:[%s1168_s2] ss:$0 sm:$0xff] }
  0x2b   :  { %861 = vmatpush3.bf16.msra.mxu0 %v893_v5  ;;  %v929_v40 = vld [vmem:[#allocation9] sm:$0xff]   ;;  %v277_v58 = vld [vmem:[%s1170_s4] sm:$0xf] }
  0x2c   :  { %862 = vmatprep.subr.bf16.mxu0 %v1052_v0  ;;  %v930_v41 = vld [vmem:[#allocation9 + $0x80] sm:$0xff]   ;;  %v282_v61 = vrot.slane %v277_v58, %v281_v56  ;;  %v290_v62 = vrot.slane %v277_v58, %v289_v57  ;;  %v286_v63 = vrot.slane %v277_v58, %v285_v59  ;;  %v294_v1 = vrot.slane %v277_v58, %v293_v60  ;;  %v806_v57 = vld [vmem:[%s1166_s0] sm:$0xff]  }
  0x2f   :  { %863 = vmatpush3.bf16.msra.mxu0 %v894_v8 }
  0x30   :  { %864 = vmatprep.subr.bf16.mxu0 %v1052_v0  ;;  %823 = vmatpush3.bf16.xpose.msra.mxu1 %v909_v14 }
  0x31   :  { %824 = vmatprep.subr.bf16.mxu1 %v911_v16 }
  0x33   :  { %865 = vmatpush3.bf16.msra.mxu0 %v895_v9 }
  0x34   :  { %866 = vmatprep.subr.bf16.mxu0 %v1052_v0 }
  0x37   :  { %867 = vmatpush3.bf16.msra.mxu0 %v896_v12 }
  0x38   :  { %868 = vmatprep.subr.bf16.mxu0 %v1052_v0  ;;  %825 = vmatpush3.bf16.xpose.msra.mxu1 %v913_v20 }
  0x39   :  { %826 = vmatprep.subr.bf16.mxu1 %v915_v26 }
  0x3b   :  { %869 = vmatpush3.bf16.msra.mxu0 %v897_v13 }
  0x3c   :  { %836 = vmatprep.subr.bf16.mxu0 %v900_v15 }
  0x3e   :  { %871 = vmatmul.mubr.bf16.vlgmr.msra.gmra.mxu0 %v898_v17 }
  0x3f   :  { %837 = vmatpush3.bf16.xpose.msra.mxu0 %v902_v18 }
  0x40   :  { %838 = vmatprep.subr.bf16.mxu0 %v904_v19  ;;  %827 = vmatpush3.bf16.xpose.msra.mxu1 %v917_v28  ;;  %v594_v28 = vld [vmem:[#allocation3 + $0x8] sm:$0xff] }
  0x41   :  { %828 = vmatprep.subr.bf16.mxu1 %v919_v30 }
  0x47   :  { %839 = vmatpush3.bf16.xpose.msra.mxu0 %v906_v21 }
  0x48   :  { %840 = vmatprep.subr.bf16.mxu0 %v908_v22  ;;  %829 = vmatpush3.bf16.xpose.msra.mxu1 %v921_v32 }
  0x49   :  { %830 = vmatprep.subr.bf16.mxu1 %v923_v34 }
  0x4f   :  { %841 = vmatpush3.bf16.xpose.msra.mxu0 %v910_v23 }
  0x50   :  { %842 = vmatprep.subr.bf16.mxu0 %v912_v24  ;;  %831 = vmatpush3.bf16.xpose.msra.mxu1 %v925_v36  ;;  %v1055_v24 = vmov 0  }
  0x51   :  { %832 = vmatprep.subr.bf16.mxu1 %v927_v38  ;;  %888 = vset.pattern.permute.xlu1 %v1055_v24 }
  0x52   :  { %889 = vset.pattern.permute.xlu0 %v1055_v24 }
  0x57   :  { %843 = vmatpush3.bf16.xpose.msra.mxu0 %v914_v25  ;;  %v1131_v25 = vld [vmem:[#allocation3] sm:$0xff] }
  0x58   :  { %844 = vmatprep.subr.bf16.mxu0 %v916_v27  ;;  %833 = vmatpush3.bf16.xpose.msra.mxu1 %v929_v40 }
  0x5f   :  { %845 = vmatpush3.bf16.xpose.msra.mxu0 %v918_v29 }
  0x60   :  { %846 = vmatprep.subr.bf16.mxu0 %v920_v31 }
  0x67   :  { %847 = vmatpush3.bf16.xpose.msra.mxu0 %v922_v33 }
  0x68   :  { %848 = vmatprep.subr.bf16.mxu0 %v924_v35 }
  0x6f   :  { %849 = vmatpush3.bf16.xpose.msra.mxu0 %v926_v37 }
  0x70   :  { %850 = vmatprep.subr.bf16.mxu0 %v928_v39 }
  0x77   :  { %851 = vmatpush3.bf16.xpose.msra.mxu0 %v930_v41 }
  0xfe   :  { %v173_v43 = vpop.f32.mrf.mxu0 }
  0xff   :  { %v174_v44 = vadd.f32 %v749_v42, %v173_v43 }
 0x100   :  { %v872_v45 = vpop.f32.mrf.mxu0 }
 0x101   :  { %932 = vtanh.f32 %v174_v44 }
 0x102   :  { %v176_v46 = vpop.f32.mrf.mxu0 }
 0x103   :  { %v177_v47 = vadd.f32 %v749_v42, %v176_v46 }
 0x104   :  { %v873_v48 = vpop.f32.mrf.mxu0 }
 0x105   :  { %934 = vtanh.f32 %v177_v47 }
 0x10e   :  { %v933_v49 = vpop.eup %932 }
 0x112   :  { %v935_v50 = vpop.eup %934 }
 0x113   :  { %v1119_v51 = vpack.c.bf16 %v935_v50, %v933_v49 }
 0x115   :  { %804 = vst [vmem:[#allocation2] sm:$0xff] %v1119_v51  }
 0x11c   :  { %v931_v52 = vld [vmem:[#allocation2] sm:$0xff]  }
 0x11d   :  { %834 = vmatprep.mubr.bf16.mxu1 %v931_v52  ;;  %852 = vmatprep.mubr.bf16.mxu0 %v931_v52 }
 0x11e   :  { %835 = vmatmul.mubr.bf16.vlgmr.msra.gmra.mxu1 %v931_v52  ;;  %853 = vmatmul.mubr.bf16.vlgmr.msra.gmra.mxu0 %v931_v52 }
 0x1de   :  { %v531_v2 = vpop.f32.mrf.mxu1  ;;  %v574_v3 = vpop.f32.mrf.mxu0 }
 0x1df   :  { %v532_v4 = vadd.f32 %v531_v2, %v282_v61  ;;  %v575_v5 = vadd.f32 %v574_v3, %v290_v62 }
 0x1e0   :  { %v533_v6 = vpop.f32.mrf.mxu1  ;;  %v576_v7 = vpop.f32.mrf.mxu0 }
 0x1e1   :  { %v534_v8 = vadd.f32 %v533_v6, %v286_v63  ;;  %v577_v9 = vadd.f32 %v576_v7, %v294_v1  ;;  %v583_v14 = vmax.f32 %v532_v4, %v575_v5  ;;  %v193_v7 = vunpack.c.h.bf16 %v1119_v51 }
 0x1e2   :  { %v535_v10 = vpop.f32.mrf.mxu1  ;;  %v578_v11 = vpop.f32.mrf.mxu0 }
 0x1e3   :  { %v536_v12 = vadd.f32 %v535_v10, %v282_v61  ;;  %v579_v13 = vadd.f32 %v578_v11, %v290_v62  ;;  %v584_v15 = vmax.f32 %v534_v8, %v577_v9  ;;  %v192_v62 = vunpack.c.l.bf16 %v1119_v51 }
 0x1e4   :  { %v537_v16 = vpop.f32.mrf.mxu1  ;;  %v580_v17 = vpop.f32.mrf.mxu0 }
 0x1e5   :  { %v538_v18 = vadd.f32 %v537_v16, %v286_v63  ;;  %v581_v19 = vadd.f32 %v580_v17, %v294_v1  ;;  %v585_v20 = vmax.f32 %v583_v14, %v584_v15  ;;  %v588_v21 = vmax.f32 %v536_v12, %v579_v13  ;;  %v648_v17 = vld [vmem:[#allocation4 + $0x8] sm:$0xff] }
 0x1e6   :  { %v807_v63 = vunpack.c.l.bf16 %v806_v57 }
 0x1e7   :  { %v589_v22 = vmax.f32 %v538_v18, %v581_v19  ;;  %586 = vmax.xlane.f32.xlu0 %v585_v20 }
 0x1e9   :  { %v590_v23 = vmax.f32 %v588_v21, %v589_v22 }
 0x1eb   :  { %591 = vmax.xlane.f32.xlu0 %v590_v23 }
 0x270   :  { %v587_v26 = vpop.xlane.xlu0 %586 }
 0x271   :  { %v595_v27 = vmax.f32 %v1131_v25, %v587_v26  ;;  %v661_v26 = vld [vmem:[%s1171_s5] sm:$0xff] }
 0x272   :  { %vm673_vm2 = vcmp.ne.s32.totalorder %v661_v26, 0 }
 0x273   :  { %v597_v29 = vsub.f32 %v1131_v25, %v595_v27  ;;  %656 = vst.msk [vmem:[#allocation3] sm:$0xff] %vm204_vm1, %v595_v27  ;;  %605 = vperm.xlu1 %888, %v595_v27  }
 0x274   :  { %v592_v30 = vpop.xlane.xlu0 %591 }
 0x275   :  { %v596_v31 = vmax.f32 %v594_v28, %v592_v30  ;;  %v599_v10 = vmul.f32 1.442695, %v597_v29 }
 0x277   :  { %v598_v32 = vsub.f32 %v594_v28, %v596_v31  ;;  %657 = vst.msk [vmem:[#allocation3 + $0x8] sm:$0xff] %vm204_vm1, %v596_v31  ;;  %610 = vperm.xlu1 %888, %v596_v31   ;;  %v662_v28 = vld [vmem:[%s1171_s5 + $0x8] sm:$0xff]  ;;  %s1056_s5 = smov [#allocation11]  }
 0x278   :  { %vm674_vm3 = vcmp.ne.s32.totalorder %v662_v28, 0  ;;  %s725_s20 = sshll.u32 %s1056_s5, 4  ;;  %s726_s20 = int_to_ptr.vmem [resolvable:$true] %s725_s20 }
 0x279   :  { %v601_v11 = vmul.f32 1.442695, %v598_v32  ;;  %s1000_s24 = scalar_lea.vmem %s726_s20, 128  ;;  %p1005_p11 = scmp.lt.s32.totalorder %s726_s20, %s726_s20 }
 0x27a   :  { %v663_v29 = vld [vmem:[#allocation3] sm:$0xff]  ;;  %p1001_p10 = scmp.ne.s32.totalorder %s726_s20, %s1000_s24  ;;  %p1006_p12 = scmp.lt.s32.totalorder %s1000_s24, %s1000_s24 }
 0x27c   :  { %p1007_p13 = por %p1006_p12, %p1005_p11 }
 0x27e   :  { %p1008_p0 = pnand %p1007_p13, %p1001_p10 }
 0x2ee   :  { %v606_v33 = vpop.permute.xlu1 %605 }
 0x2ef   :  { %v613_v34 = vsub.f32 %v532_v4, %v606_v33  ;;  %v614_v35 = vsub.f32 %v534_v8, %v606_v33  ;;  %v615_v36 = vsub.f32 %v575_v5, %v606_v33  ;;  %v616_v37 = vsub.f32 %v577_v9, %v606_v33 }
 0x2f0   :  { %v198_v5 = vmul.f32 %v807_v63, %v192_v62  ;;  %v808_v8 = vunpack.c.h.bf16 %v806_v57 }
 0x2f1   :  { %v621_v38 = vmul.f32 1.442695, %v613_v34  ;;  %v623_v39 = vmul.f32 1.442695, %v614_v35  ;;  %v625_v40 = vmul.f32 1.442695, %v615_v36 }
 0x2f2   :  { %v627_v41 = vmul.f32 1.442695, %v616_v37  ;;  %v611_v42 = vpop.permute.xlu1 %610  ;;  %v199_v9 = vmul.f32 %v808_v8, %v193_v7  ;;  %v664_v35 = vld [vmem:[#allocation3 + $0x8] sm:$0xff]  ;;  %v794_v36 = vsel %vm673_vm2, 1.0, %v1052_v0 }
 0x2f3   :  { %936 = vpow2.f32 %v621_v38  ;;  %v617_v43 = vsub.f32 %v536_v12, %v611_v42  ;;  %v618_v44 = vsub.f32 %v538_v18, %v611_v42  ;;  %v619_v45 = vsub.f32 %v579_v13, %v611_v42  ;;  %v647_v13 = vld [vmem:[#allocation4] sm:$0xff] }
 0x2f4   :  { %938 = vpow2.f32 %v623_v39  ;;  %v620_v46 = vsub.f32 %v581_v19, %v611_v42  ;;  %v795_v39 = vsel %vm674_vm3, 1.0, %v1052_v0 }
 0x2f5   :  { %940 = vpow2.f32 %v625_v40  ;;  %v629_v47 = vmul.f32 1.442695, %v617_v43  ;;  %v631_v48 = vmul.f32 1.442695, %v618_v44  ;;  %v633_v49 = vmul.f32 1.442695, %v619_v45 }
 0x2f6   :  { %942 = vpow2.f32 %v627_v41  ;;  %v635_v50 = vmul.f32 1.442695, %v620_v46 }
 0x2f7   :  { %944 = vpow2.f32 %v629_v47 }
 0x2f8   :  { %946 = vpow2.f32 %v631_v48 }
 0x2f9   :  { %948 = vpow2.f32 %v633_v49 }
 0x2fa   :  { %950 = vpow2.f32 %v635_v50 }
 0x2fb   :  { %952 = vpow2.f32 %v599_v10 }
 0x2fc   :  { %954 = vpow2.f32 %v601_v11 }
 0x300   :  { %v937_v52 = vpop.eup %936 }
 0x301   :  { %v939_v53 = vpop.eup %938 }
 0x302   :  { %v941_v54 = vpop.eup %940  ;;  %v637_v55 = vadd.f32 %v939_v53, %v937_v52 }
 0x303   :  { %v943_v56 = vpop.eup %942 }
 0x304   :  { %v945_v58 = vpop.eup %944  ;;  %v638_v59 = vadd.f32 %v941_v54, %v637_v55 }
 0x305   :  { %v947_v60 = vpop.eup %946 }
 0x306   :  { %v639_v61 = vadd.f32 %v943_v56, %v638_v59  ;;  %v642_v1 = vadd.f32 %v947_v60, %v945_v58  ;;  %v949_v2 = vpop.eup %948 }
 0x307   :  { %v951_v4 = vpop.eup %950 }
 0x308   :  { %640 = vadd.xlane.f32.xlu0 %v639_v61  ;;  %v643_v3 = vadd.f32 %v949_v2, %v642_v1  ;;  %v953_v12 = vpop.eup %952 }
 0x309   :  { %v649_v14 = vmul.f32 %v953_v12, %v647_v13  ;;  %v955_v15 = vpop.eup %954 }
 0x30a   :  { %v644_v6 = vadd.f32 %v951_v4, %v643_v3  ;;  %v650_v19 = vmul.f32 %v955_v15, %v648_v17 }
 0x30c   :  { %200 = vadd.xlane.f32.xlu0 %v198_v5  ;;  %645 = vadd.xlane.f32.xlu1 %v644_v6 }
 0x310   :  { %202 = vadd.xlane.f32.xlu0 %v199_v9 }
 0x391   :  { %v641_v16 = vpop.xlane.xlu0 %640 }
 0x392   :  { %v651_v18 = vadd.f32 %v649_v14, %v641_v16 }
 0x394   :  { %654 = vst.msk [vmem:[#allocation4] sm:$0xff] %vm204_vm1, %v651_v18 }
 0x395   :  { %v646_v51 = vpop.xlane.xlu1 %645  ;;  %v201_v20 = vpop.xlane.xlu0 %200 }
 0x396   :  { %v652_v21 = vadd.f32 %v650_v19, %v646_v51  ;;  %205 = vst.msk [vmem:[#allocation5] sm:$0xff] %vm204_vm1, %v201_v20 }
 0x398   :  { %655 = vst.msk [vmem:[#allocation4 + $0x8] sm:$0xff] %vm204_vm1, %v652_v21 }
 0x399   :  { %v203_v22 = vpop.xlane.xlu0 %202 }
 0x39a   :  { %206 = vst.msk [vmem:[#allocation5 + $0x8] sm:$0xff] %vm204_vm1, %v203_v22 }
 0x39b   :  { %v665_v23 = vld [vmem:[#allocation4] sm:$0xff] }
 0x39c   :  { %956 = vlog2.f32 %v665_v23 }
 0x39d   :  { %v679_v32 = vld [vmem:[#allocation5] sm:$0xff] }
 0x39e   :  { %vm697_vm5 = vcmp.ge.f32.partialorder %v679_v32, %v663_v29 }
 0x39f   :  { %v666_v24 = vld [vmem:[#allocation4 + $0x8] sm:$0xff]  ;;  %v796_v47 = vsel %vm697_vm5, 1.0, %v1052_v0 }
 0x3a0   :  { %958 = vlog2.f32 %v666_v24  ;;  %v703_v49 = vsel %vm204_vm1, %v796_v47, 0.0 }
 0x3a1   :  { %v680_v37 = vld [vmem:[#allocation5 + $0x8] sm:$0xff] }
 0x3a2   :  { %vm698_vm4 = vcmp.ge.f32.partialorder %v680_v37, %v664_v35 }
 0x3a3   :  { %v797_v43 = vsel %vm698_vm4, 1.0, %v1052_v0 }
 0x3a4   :  { %v704_v48 = vsel %vm204_vm1, %v797_v43, 0.0 }
 0x3a5   :  { %v705_v50 = vadd.f32 %v704_v48, %v703_v49 }
 0x3a9   :  { %v957_v25 = vpop.eup %956 }
 0x3aa   :  { %v668_v27 = vmul.f32 0.6931472, %v957_v25 }
 0x3ac   :  { %v671_v30 = vadd.f32 %v668_v27, %v663_v29 }
 0x3ad   :  { %v959_v31 = vpop.eup %958 }
 0x3ae   :  { %v670_v33 = vmul.f32 0.6931472, %v959_v31  ;;  %v681_v34 = vsub.f32 %v671_v30, %v679_v32 }
 0x3b0   :  { %v672_v38 = vadd.f32 %v670_v33, %v664_v35  ;;  %v683_v41 = vmul.f32 %v794_v36, %v681_v34 }
 0x3b2   :  { %v682_v40 = vsub.f32 %v672_v38, %v680_v37  ;;  %v685_v44 = vsel %vm204_vm1, %v683_v41, 0.0 }
 0x3b4   :  { %v684_v42 = vmul.f32 %v795_v39, %v682_v40 }
 0x3b6   :  { %v686_v45 = vsel %vm204_vm1, %v684_v42, 0.0 }
 0x3b7   :  { %v687_v46 = vadd.f32 %v686_v45, %v685_v44 }
 0x3b9   :  { %688 = vadd.xlane.f32.xlu0 %v687_v46 }
 0x3bd   :  { %706 = vadd.xlane.f32.xlu0 %v705_v50 }
 0x442   :  { %v689_v52 = vpop.xlane.xlu0 %688 }
 0x443   :  { %v690_v53 = vrot.slane %v689_v52, 4 }
 0x445   :  { %v691_v54 = vadd.f32 %v690_v53, %v689_v52 }
 0x446   :  { %v707_v55 = vpop.xlane.xlu0 %706 }
 0x447   :  { %v692_v56 = vrot.slane %v691_v54, 2  ;;  %v708_v57 = vrot.slane %v707_v55, 4 }
 0x449   :  { %v709_v58 = vadd.f32 %v708_v57, %v707_v55  ;;  %v693_v59 = vadd.f32 %v692_v56, %v691_v54 }
 0x44b   :  { %v710_v60 = vrot.slane %v709_v58, 2  ;;  %v694_v61 = vrot.slane %v693_v59, 1 }
 0x44d   :  { %v711_v62 = vadd.f32 %v710_v60, %v709_v58  ;;  %v695_v63 = vadd.f32 %v694_v61, %v693_v59 }
 0x44f   :  { %874 = vpush %v695_v63  ;;  %v712_v0 = vrot.slane %v711_v62, 1 }
 0x451   :  { %v713_v1 = vadd.f32 %v712_v0, %v711_v62 }
 0x453   :  { %876 = vpush %v713_v1 }
 0x480   :  { %s875_s21 = spop %874 }
 0x481   :  { %v715_v2 = vstv %s875_s21 }
 0x482   :  { %716 = vst [vmem:[#allocation11] sm:$0xff] %v715_v2 }
 0x483   :  { %1011 = shalt.err (!%p1008_p0)
}
 0x484   :  { %728 = dma.vmem_to_hbm [thread:$0]  %s726_s20, 128, %s1172_s6, [#allocation8]  }
 0x485   :  { %s877_s27 = spop %876  ;;  %s1020_s28 = scalar_lea.vmem %s736_s23, 128 }
 0x486   :  { %v717_v3 = vstv %s877_s27  ;;  %p1021_p1 = scmp.ne.s32.totalorder %s736_s23, %s1020_s28  ;;  %p1025_p2 = scmp.lt.s32.totalorder %s736_s23, %s736_s23 }
 0x487   :  { %718 = vst [vmem:[#allocation12] sm:$0xff] %v717_v3  ;;  %p1026_p3 = scmp.lt.s32.totalorder %s1020_s28, %s1020_s28 }
 0x489   :  { %p1027_p4 = por %p1026_p3, %p1025_p2 }
 0x48b   :  { %p1028_p5 = pnand %p1027_p4, %p1021_p1 }
 0x48d   :  { %1031 = shalt.err (!%p1028_p5)
}
 0x48e   :  { %738 = dma.vmem_to_hbm [thread:$0]  %s736_s23, 128, %s1173_s7, [#allocation13]  }
 0x48f   :  { %1044 = dma.done.wait [#allocation8], 128  }
 0x490   :  { %1045 = vsyncadd [#allocation8], 4294967168 }
 0x491   :  { %1046 = dma.done.wait [#allocation13], 128  }
 0x492   :  { %1047 = vsyncadd [#allocation13], 4294967168 }
 0x493   :  { %745 = vsyncpa [#allocation7], 1 }
 0x494   :  { %746 = vsyncpa [#allocation10], 1 }
 0x495   :  { %747 = vsyncpa [#allocation8], 1 }
 0x496   :  { %748 = vsyncpa [#allocation13], 1 }

</bundles_post_ra>
